<compile_context>
chip_gen: v7x
topology: tpu7x:2x2x1
jax: 0.10.0
libtpu: 0.0.40
codegen_flags: <defaults>
</compile_context>

<pallas_src>
import jax
import jax.numpy as jnp
from jax.experimental import pallas as pl
from jax.experimental.pallas import tpu as pltpu

# Hyperparameters from the PyTorch module
B_CLASSES = 15             # hp.B_classes (value levels per brick)
B_BRICKS = 10              # hp.B_bricks
NUM_OUT = 10 + 1           # len(MNIST_classes) + 1
H = W = 28
HO = WO = 27
D_FLAT = HO * WO           # 729 (mvbrick in_features)
HW = H * W                 # 784 (flattened input image)
BC = B_BRICKS * B_CLASSES  # 150
BC_PAD = 256               # brick*class dim padded to a full MXU tile
OUT_PAD = 128              # output dim padded for lane-dense stores
K_SKEW = 768               # trimmed skewed matmul K (6*128; last nonzero row is 754)
XW = 896                   # flattened input padded width (multiple of 128, >= K_SKEW + 29)
TM_MAX = 1024              # max batch-tile rows per grid step


def _round_up(x, m):
    return (x + m - 1) // m * m


def _choose_tm(n, tm_max=TM_MAX):
    """Batch tile: big enough to amortize the ~0.35us per-grid-step overhead, small enough
    that medium/large batches get >= 2 grid steps (both v7x TensorCores get work)."""
    half = _round_up(max((n + 1) // 2, 1), 16)   # multiple of 16 (bf16 packed sublanes)
    return max(min(tm_max, half), 16)


# ----------------------------- fused kernel -----------------------------
def fused_kernel(x_ref, wc_ref, cb_ref, w1_ref, b1_ref, sel_ref, w2_ref, b2_ref, out_ref):
    # x_ref : (TM, 896) bf16  zero-padded, row-major flattened 28x28 image (lane-dense)
    # wc_ref: (4,) SMEM f32   [w00, w01, w10, w11]; cb_ref: (1,) SMEM conv bias
    # w1_ref: (768, 256) bf16 skewed + trimmed + zero-padded MultiValueBrick weight
    # b1_ref: (1, 256) f32    zero-padded bias
    # sel_ref:(256, 20) f32   combined EV selector: cols 0..9 level-weighted sum, 10..19 group sum
    # w2_ref: (10, 128) f32   zero-padded OutBrick weight; b2_ref: (1, 128)
    # out_ref:(TM, 128) f32
    xf = x_ref[...].astype(jnp.float32)       # conv/sigmoid math in f32 (v5e-safe)
    w00 = wc_ref[0]
    w01 = wc_ref[1]
    w10 = wc_ref[2]
    w11 = wc_ref[3]
    cb = cb_ref[0]

    # 2x2 valid conv on the flattened image: output slot k = i*28 + j needs inputs
    # k, k+1, k+28, k+29.  Slots with j == 27 (and the trimmed i == 27 rows) hold junk
    # values, but the matching rows of the skewed w1 are exactly zero so they never reach
    # the matmul.  Max input index touched: 767 + 29 = 796 < 896.
    a = xf[:, 0:K_SKEW]
    b = xf[:, 1:K_SKEW + 1]
    c = xf[:, 28:K_SKEW + 28]
    d = xf[:, 29:K_SKEW + 29]
    y = jax.nn.sigmoid(w00 * a + w01 * b + w10 * c + w11 * d + cb)        # (TM, 768) f32

    # MultiValueBrick linear on the MXU in bf16 (K=768, N=256), f32 accumulation.
    yb = y.astype(jnp.bfloat16)
    logits = jnp.dot(yb, w1_ref[...], preferred_element_type=jnp.float32) + b1_ref[...]

    # Per-brick softmax expected value via one combined selector matmul.
    # Global row max is an exact stabilizer (constant per row); logits are bounded
    # (|logit| <~ 30 with sigmoid inputs), so per-brick underflow cannot occur.
    m = jnp.max(logits, axis=-1, keepdims=True)
    e = jnp.exp(logits - m)
    nd = jnp.dot(e, sel_ref[...], preferred_element_type=jnp.float32)     # (TM, 20)
    num = nd[:, :B_BRICKS]
    den = nd[:, B_BRICKS:]
    bricks = num * pl.reciprocal(den)          # exact reciprocal; (TM,10) is negligible work

    # OutBrick linear, lane-dense 128-wide output.
    out_ref[...] = (jnp.dot(bricks, w2_ref[...], preferred_element_type=jnp.float32)
                    + b2_ref[...])


# ----------------------------- wrapper -----------------------------
def conv_multi_value_net(x_nchw, kparams, *, tm_max=TM_MAX):
    """x_nchw: (N, 1, 28, 28) float32 -> (N, NUM_OUT) float32.  Jit this wrapper so the
    pad + bf16 cast of x fuses into a single HBM pass."""
    conv_w, conv_b, w1s, b1p, selp, w2p, b2p = kparams
    n = x_nchw.shape[0]

    tm = _choose_tm(n, tm_max)
    n_pad = _round_up(n, tm)

    # Lane-dense flattened bf16 layout, padded so the +1/+28/+29 shifts stay in bounds.
    x_flat = x_nchw.reshape(n, HW).astype(jnp.bfloat16)
    xp = jnp.pad(x_flat, ((0, n_pad - n), (0, XW - HW)))

    smem = pl.BlockSpec(memory_space=pltpu.MemorySpace.SMEM)

    # Scoped-VMEM budget derived from the actual buffers (+ headroom for compiler temps):
    # above v5e's 16 MiB scoped default, capped safely below v7x's 64 MiB/TC physical.
    est = (2 * tm * XW * 2           # double-buffered bf16 x tiles
           + 2 * tm * OUT_PAD * 4    # double-buffered f32 out tiles
           + 10 * tm * K_SKEW * 4    # conv/sigmoid/matmul f32 temporaries (headroom)
           + (2 << 20))              # resident weights + slack
    vmem_limit = int(min(max(est, 16 << 20), 48 << 20))

    out = pl.pallas_call(
        fused_kernel,
        out_shape=jax.ShapeDtypeStruct((n_pad, OUT_PAD), jnp.float32),
        grid=(n_pad // tm,),
        in_specs=[
            pl.BlockSpec((tm, XW), lambda i: (i, 0)),                 # x (batch-tiled, bf16)
            smem,                                                     # conv weights (scalars)
            smem,                                                     # conv bias (scalar)
            pl.BlockSpec((K_SKEW, BC_PAD), lambda i: (0, 0)),         # w1 bf16 (VMEM resident)
            pl.BlockSpec((1, BC_PAD), lambda i: (0, 0)),              # b1
            pl.BlockSpec((BC_PAD, 2 * B_BRICKS), lambda i: (0, 0)),   # combined EV selector
            pl.BlockSpec((B_BRICKS, OUT_PAD), lambda i: (0, 0)),      # w2
            pl.BlockSpec((1, OUT_PAD), lambda i: (0, 0)),             # b2
        ],
        out_specs=pl.BlockSpec((tm, OUT_PAD), lambda i: (i, 0)),
        compiler_params=pltpu.CompilerParams(
            dimension_semantics=("parallel",),
            vmem_limit_bytes=vmem_limit),
    )(xp, conv_w, conv_b, w1s, b1p, selp, w2p, b2p)

    return out[:n, :NUM_OUT]


# ----------------------------- parameter init & packing -----------------------------
def init_params(key):
    """Raw parameters matching the PyTorch module layout."""
    ks = jax.random.split(key, 6)
    # Conv2d(1,1,2): fan_in = 4 -> bound 0.5
    conv_w = jax.random.uniform(ks[0], (1, 1, 2, 2), jnp.float32, -0.5, 0.5)
    conv_b = jax.random.uniform(ks[1], (1,), jnp.float32, -0.5, 0.5)
    # MultiValueBrick: Linear(729 -> B*C), column index = b*C + c (brick-major)
    bnd1 = 1.0 / jnp.sqrt(jnp.float32(D_FLAT))
    w1 = jax.random.uniform(ks[2], (D_FLAT, BC), jnp.float32, -bnd1, bnd1)
    b1 = jax.random.uniform(ks[3], (BC,), jnp.float32, -bnd1, bnd1)
    # OutBrick: Linear(B -> NUM_OUT)
    bnd2 = 1.0 / jnp.sqrt(jnp.float32(B_BRICKS))
    w2 = jax.random.uniform(ks[4], (B_BRICKS, NUM_OUT), jnp.float32, -bnd2, bnd2)
    b2 = jax.random.uniform(ks[5], (NUM_OUT,), jnp.float32, -bnd2, bnd2)
    return conv_w, conv_b, w1, b1, w2, b2


def prepare_kernel_params(raw):
    """Skew/pad/trim raw params once on the host side into the kernel's lane-dense layout."""
    conv_w, conv_b, w1, b1, w2, b2 = raw
    conv_w_flat = conv_w.reshape(4)                                   # [w00, w01, w10, w11]

    # Skew + pad + trim w1: (729,150) -> (768,256) bf16; skewed row i*28+j holds original
    # row i*27+j; rows with i==27 or j==27 and cols 150..255 are exactly zero.  Rows
    # 755..783 are all-zero, so trimming K to 768 (6x128) is exact.
    w1_3d = w1.reshape(HO, WO, BC)
    w1_skew = jnp.pad(w1_3d, ((0, 1), (0, 1), (0, BC_PAD - BC))).reshape(HW, BC_PAD)
    w1_skew = w1_skew[:K_SKEW].astype(jnp.bfloat16)
    b1_p = jnp.pad(b1.reshape(1, BC), ((0, 0), (0, BC_PAD - BC)))

    # Combined expected-value selector (per-brick softmax numerator / denominator).
    levels = jnp.linspace(0.0, 1.0, B_CLASSES, dtype=jnp.float32)     # TODO(synk): assumed value levels
    g = jnp.repeat(jnp.eye(B_BRICKS, dtype=jnp.float32), B_CLASSES, axis=0)   # (150,10)
    slev = g * jnp.tile(levels, B_BRICKS)[:, None]                            # (150,10)
    sel = jnp.concatenate([slev, g], axis=1)                                  # (150,20)
    sel_p = jnp.pad(sel, ((0, BC_PAD - BC), (0, 0)))                          # (256,20)

    w2_p = jnp.pad(w2, ((0, 0), (0, OUT_PAD - NUM_OUT)))                      # (10,128)
    b2_p = jnp.pad(b2.reshape(1, NUM_OUT), ((0, 0), (0, OUT_PAD - NUM_OUT)))  # (1,128)
    return conv_w_flat, conv_b, w1_skew, b1_p, sel_p, w2_p, b2_p


# ----------------------------- pure-JAX reference (f32) -----------------------------
def reference(x_nchw, raw):
    conv_w, conv_b, w1, b1, w2, b2 = raw
    cw = conv_w.reshape(4)
    n = x_nchw.shape[0]
    x = x_nchw[:, 0]
    y = (cw[0] * x[:, :HO, :WO] + cw[1] * x[:, :HO, 1:]
         + cw[2] * x[:, 1:, :WO] + cw[3] * x[:, 1:, 1:]) + conv_b[0]
    y = jax.nn.sigmoid(y)
    xf = y.reshape(n, D_FLAT)
    logits = (xf @ w1 + b1).reshape(n, B_BRICKS, B_CLASSES)
    p = jax.nn.softmax(logits, axis=-1)
    levels = jnp.linspace(0.0, 1.0, B_CLASSES, dtype=jnp.float32)
    bricks = (p * levels).sum(-1)
    return bricks @ w2 + b2


if __name__ == "__main__":
    key = jax.random.PRNGKey(0)
    k_x, k_p = jax.random.split(key)
    # MNIST-like input, batch=2, NCHW
    x = jax.random.uniform(k_x, (2, 1, H, W), jnp.float32)
    raw = init_params(k_p)
    kparams = prepare_kernel_params(raw)

    fwd = jax.jit(lambda xx: conv_multi_value_net(xx, kparams))
    out = jax.block_until_ready(fwd(x))

    ref = reference(x, raw)
    assert out.shape == (2, NUM_OUT)
    # Tolerance relaxed for the bf16 (y, w1) main matmul vs the pure-f32 reference.
    assert jnp.allclose(out, ref, atol=3e-2, rtol=3e-2), "mismatch vs reference"
    print("KERNEL_OK")
</pallas_src>

<mosaic_0001>
module attributes {stable_mosaic.version = 11 : i64} {
  func.func @fused_kernel(%arg0: i32, %arg1: memref<16x896xbf16, #tpu.memory_space<vmem>>, %arg2: memref<4xf32, #tpu.memory_space<smem>>, %arg3: memref<1xf32, #tpu.memory_space<smem>>, %arg4: memref<768x256xbf16, #tpu.memory_space<vmem>>, %arg5: memref<1x256xf32, #tpu.memory_space<vmem>>, %arg6: memref<256x20xf32, #tpu.memory_space<vmem>>, %arg7: memref<10x128xf32, #tpu.memory_space<vmem>>, %arg8: memref<1x128xf32, #tpu.memory_space<vmem>>, %arg9: memref<16x128xf32, #tpu.memory_space<vmem>>) attributes {dimension_semantics = [#tpu.dimension_semantics<parallel>], iteration_bounds = array<i64: 1>, scalar_prefetch = 0 : i64, scratch_operands = 0 : i64, tpu.core_type = #tpu.core_type<tc>, window_params = [{transform_indices = @transform_0, window_bounds = array<i64: 16, 896>}, {transform_indices = @transform_1, window_bounds = array<i64: 4>}, {transform_indices = @transform_2, window_bounds = array<i64: 1>}, {pipeline_mode = #tpu.pipeline_mode<synchronous>, transform_indices = @transform_3, window_bounds = array<i64: 768, 256>}, {pipeline_mode = #tpu.pipeline_mode<synchronous>, transform_indices = @transform_4, window_bounds = array<i64: 1, 256>}, {pipeline_mode = #tpu.pipeline_mode<synchronous>, transform_indices = @transform_5, window_bounds = array<i64: 256, 20>}, {pipeline_mode = #tpu.pipeline_mode<synchronous>, transform_indices = @transform_6, window_bounds = array<i64: 10, 128>}, {pipeline_mode = #tpu.pipeline_mode<synchronous>, transform_indices = @transform_7, window_bounds = array<i64: 1, 128>}, {transform_indices = @transform_8, window_bounds = array<i64: 16, 128>}]} {
    %c0 = arith.constant 0 : index
    %c0_0 = arith.constant 0 : index
    %0 = vector.load %arg1[%c0, %c0_0] : memref<16x896xbf16, #tpu.memory_space<vmem>>, vector<16x896xbf16>
    %1 = arith.extf %0 : vector<16x896xbf16> to vector<16x896xf32>
    %c0_1 = arith.constant 0 : index
    %2 = memref.load %arg2[%c0_1] : memref<4xf32, #tpu.memory_space<smem>>
    %c1 = arith.constant 1 : index
    %3 = memref.load %arg2[%c1] : memref<4xf32, #tpu.memory_space<smem>>
    %c2 = arith.constant 2 : index
    %4 = memref.load %arg2[%c2] : memref<4xf32, #tpu.memory_space<smem>>
    %c3 = arith.constant 3 : index
    %5 = memref.load %arg2[%c3] : memref<4xf32, #tpu.memory_space<smem>>
    %c0_2 = arith.constant 0 : index
    %6 = memref.load %arg3[%c0_2] : memref<1xf32, #tpu.memory_space<smem>>
    %7 = vector.extract_strided_slice %1 {offsets = [0, 0], sizes = [16, 768], strides = [1, 1]} : vector<16x896xf32> to vector<16x768xf32>
    %8 = vector.extract_strided_slice %1 {offsets = [0, 1], sizes = [16, 768], strides = [1, 1]} : vector<16x896xf32> to vector<16x768xf32>
    %9 = vector.extract_strided_slice %1 {offsets = [0, 28], sizes = [16, 768], strides = [1, 1]} : vector<16x896xf32> to vector<16x768xf32>
    %10 = vector.extract_strided_slice %1 {offsets = [0, 29], sizes = [16, 768], strides = [1, 1]} : vector<16x896xf32> to vector<16x768xf32>
    %11 = vector.broadcast %2 : f32 to vector<16x768xf32>
    %12 = arith.mulf %11, %7 : vector<16x768xf32>
    %13 = vector.broadcast %3 : f32 to vector<16x768xf32>
    %14 = arith.mulf %13, %8 : vector<16x768xf32>
    %15 = arith.addf %12, %14 : vector<16x768xf32>
    %16 = vector.broadcast %4 : f32 to vector<16x768xf32>
    %17 = arith.mulf %16, %9 : vector<16x768xf32>
    %18 = arith.addf %15, %17 : vector<16x768xf32>
    %19 = vector.broadcast %5 : f32 to vector<16x768xf32>
    %20 = arith.mulf %19, %10 : vector<16x768xf32>
    %21 = arith.addf %18, %20 : vector<16x768xf32>
    %22 = vector.broadcast %6 : f32 to vector<16x768xf32>
    %23 = arith.addf %21, %22 : vector<16x768xf32>
    %24 = arith.negf %23 : vector<16x768xf32>
    %25 = math.exp %24 : vector<16x768xf32>
    %cst = arith.constant 1.000000e+00 : f32
    %26 = vector.broadcast %cst : f32 to vector<16x768xf32>
    %27 = arith.addf %26, %25 : vector<16x768xf32>
    %28 = arith.divf %26, %27 : vector<16x768xf32>
    %29 = arith.truncf %28 : vector<16x768xf32> to vector<16x768xbf16>
    %c0_3 = arith.constant 0 : index
    %c0_4 = arith.constant 0 : index
    %30 = vector.load %arg4[%c0_3, %c0_4] : memref<768x256xbf16, #tpu.memory_space<vmem>>, vector<768x256xbf16>
    %cst_5 = arith.constant dense<0.000000e+00> : vector<16x256xf32>
    %31 = tpu.matmul %29, %30, %cst_5 {dimension_numbers = #tpu.dot_dimension_numbers<[1], [0], [0], [1], [0, 0, 1, 1], [], []>} : vector<16x768xbf16>, vector<768x256xbf16>, vector<16x256xf32> -> vector<16x256xf32>
    %c0_6 = arith.constant 0 : index
    %c0_7 = arith.constant 0 : index
    %32 = vector.load %arg5[%c0_6, %c0_7] : memref<1x256xf32, #tpu.memory_space<vmem>>, vector<1x256xf32>
    %33 = vector.broadcast %32 : vector<1x256xf32> to vector<16x256xf32>
    %34 = arith.addf %31, %33 : vector<16x256xf32>
    %cst_8 = arith.constant dense<0xFF800000> : vector<16xf32>
    %35 = vector.multi_reduction <maximumf>, %34, %cst_8 [1] : vector<16x256xf32> to vector<16xf32>
    %36 = vector.shape_cast %35 : vector<16xf32> to vector<16x1xf32>
    %37 = vector.broadcast %36 : vector<16x1xf32> to vector<16x256xf32>
    %38 = arith.subf %34, %37 : vector<16x256xf32>
    %39 = math.exp %38 : vector<16x256xf32>
    %c0_9 = arith.constant 0 : index
    %c0_10 = arith.constant 0 : index
    %40 = vector.load %arg6[%c0_9, %c0_10] : memref<256x20xf32, #tpu.memory_space<vmem>>, vector<256x20xf32>
    %cst_11 = arith.constant dense<0.000000e+00> : vector<16x20xf32>
    %41 = tpu.matmul %39, %40, %cst_11 {dimension_numbers = #tpu.dot_dimension_numbers<[1], [0], [0], [1], [0, 0, 1, 1], [], []>} : vector<16x256xf32>, vector<256x20xf32>, vector<16x20xf32> -> vector<16x20xf32>
    %42 = vector.extract_strided_slice %41 {offsets = [0, 0], sizes = [16, 10], strides = [1, 1]} : vector<16x20xf32> to vector<16x10xf32>
    %43 = vector.extract_strided_slice %41 {offsets = [0, 10], sizes = [16, 10], strides = [1, 1]} : vector<16x20xf32> to vector<16x10xf32>
    %44 = tpu.reciprocal %43 : vector<16x10xf32> -> vector<16x10xf32>
    %45 = arith.mulf %42, %44 : vector<16x10xf32>
    %c0_12 = arith.constant 0 : index
    %c0_13 = arith.constant 0 : index
    %46 = vector.load %arg7[%c0_12, %c0_13] : memref<10x128xf32, #tpu.memory_space<vmem>>, vector<10x128xf32>
    %cst_14 = arith.constant dense<0.000000e+00> : vector<16x128xf32>
    %47 = tpu.matmul %45, %46, %cst_14 {dimension_numbers = #tpu.dot_dimension_numbers<[1], [0], [0], [1], [0, 0, 1, 1], [], []>} : vector<16x10xf32>, vector<10x128xf32>, vector<16x128xf32> -> vector<16x128xf32>
    %c0_15 = arith.constant 0 : index
    %c0_16 = arith.constant 0 : index
    %48 = vector.load %arg8[%c0_15, %c0_16] : memref<1x128xf32, #tpu.memory_space<vmem>>, vector<1x128xf32>
    %49 = vector.broadcast %48 : vector<1x128xf32> to vector<16x128xf32>
    %50 = arith.addf %47, %49 : vector<16x128xf32>
    %c0_17 = arith.constant 0 : index
    %c0_18 = arith.constant 0 : index
    %51 = vector.load %arg9[%c0_17, %c0_18] : memref<16x128xf32, #tpu.memory_space<vmem>>, vector<16x128xf32>
    tpu.vector_store %arg9[%c0_17, %c0_18], %50 {strides = array<i32>} : memref<16x128xf32, #tpu.memory_space<vmem>>, vector<16x128xf32>,
    return
  }
  func.func @transform_0(%arg0: i32) -> (i32, i32) {
    %c0_i32 = arith.constant 0 : i32
    %c0_i32_0 = arith.constant 0 : i32
    return %arg0, %c0_i32 : i32, i32
  }
  func.func @transform_1(%arg0: i32) -> i32 {
    %c0_i32 = arith.constant 0 : i32
    %c0_i32_0 = arith.constant 0 : i32
    return %c0_i32 : i32
  }
  func.func @transform_2(%arg0: i32) -> i32 {
    %c0_i32 = arith.constant 0 : i32
    %c0_i32_0 = arith.constant 0 : i32
    return %c0_i32 : i32
  }
  func.func @transform_3(%arg0: i32) -> (i32, i32) {
    %c0_i32 = arith.constant 0 : i32
    %c0_i32_0 = arith.constant 0 : i32
    %c0_i32_1 = arith.constant 0 : i32
    return %c0_i32, %c0_i32_0 : i32, i32
  }
  func.func @transform_4(%arg0: i32) -> (i32, i32) {
    %c0_i32 = arith.constant 0 : i32
    %c0_i32_0 = arith.constant 0 : i32
    %c0_i32_1 = arith.constant 0 : i32
    return %c0_i32, %c0_i32_0 : i32, i32
  }
  func.func @transform_5(%arg0: i32) -> (i32, i32) {
    %c0_i32 = arith.constant 0 : i32
    %c0_i32_0 = arith.constant 0 : i32
    %c0_i32_1 = arith.constant 0 : i32
    return %c0_i32, %c0_i32_0 : i32, i32
  }
  func.func @transform_6(%arg0: i32) -> (i32, i32) {
    %c0_i32 = arith.constant 0 : i32
    %c0_i32_0 = arith.constant 0 : i32
    %c0_i32_1 = arith.constant 0 : i32
    return %c0_i32, %c0_i32_0 : i32, i32
  }
  func.func @transform_7(%arg0: i32) -> (i32, i32) {
    %c0_i32 = arith.constant 0 : i32
    %c0_i32_0 = arith.constant 0 : i32
    %c0_i32_1 = arith.constant 0 : i32
    return %c0_i32, %c0_i32_0 : i32, i32
  }
  func.func @transform_8(%arg0: i32) -> (i32, i32) {
    %c0_i32 = arith.constant 0 : i32
    %c0_i32_0 = arith.constant 0 : i32
    return %arg0, %c0_i32 : i32, i32
  }
}

</mosaic_0001>

<bundles_post_ra>
// kernel: _lambda_.1
= control target key start
LH: loop header
LB: loop body
LE: loop exit
PB: predicated region body
PF: predicated region fallthrough
CT: control target
= control target key end

     0   :  { %14 = vsyncpa [#allocation4], 0  ;;  %s2644_s0 = inlined_call_operand.vmem [shape: bf16[16,896], index: 0, kind: input, shape index: {}]   ;;  %s2645_s1 = inlined_call_operand.vmem [shape: f32[4], index: 1, kind: input, shape index: {}]   ;;  %s2646_s2 = inlined_call_operand.<no memory space> [shape: f32[1], index: 2, kind: input, shape index: {}]   ;;  %s2647_s3 = inlined_call_operand.vmem [shape: bf16[768,256], index: 3, kind: input, shape index: {}]   ;;  %s2648_s4 = inlined_call_operand.vmem [shape: f32[1,256], index: 4, kind: input, shape index: {}]   ;;  %s2649_s5 = inlined_call_operand.vmem [shape: f32[256,20], index: 5, kind: input, shape index: {}]   ;;  %s2650_s6 = inlined_call_operand.vmem [shape: f32[10,128], index: 6, kind: input, shape index: {}]   ;;  %s2651_s7 = inlined_call_operand.vmem [shape: f32[1,128], index: 7, kind: input, shape index: {}]   ;;  %s2652_s8 = inlined_call_operand.vmem [shape: f32[16,128], index: 8, kind: output, shape index: {}]  }
   0x1   :  { %s23_s29 = sshll.u32 %s2645_s1, 4  ;;  %s24_s29 = int_to_ptr.vmem [resolvable:$true] %s23_s29 }
   0x2   :  { %s1836_s30 = scalar_lea.vmem %s24_s29, 16  ;;  %p1841_p1 = scmp.lt.s32.totalorder %s24_s29, %s24_s29 }
   0x3   :  { %p1837_p0 = scmp.ne.s32.totalorder %s24_s29, %s1836_s30  ;;  %p1842_p2 = scmp.lt.s32.totalorder %s1836_s30, %s1836_s30 }
   0x5   :  { %p1843_p3 = por %p1842_p2, %p1841_p1 }
   0x7   :  { %p1844_p4 = pnand %p1843_p3, %p1837_p0 }
   0x9   :  { %1847 = shalt.err (!%p1844_p4)
}
   0xa   :  { %s1850_s9 = smov [#allocation3]  }
   0xb   :  { %26 = dma.vmem_to_smem %s24_s29, 16, %s1850_s9, [#allocation4]  }
   0xc   :  { %1848 = dma.done.wait [#allocation4], 16  }
   0xd   :  { %1849 = vsyncadd [#allocation4], 4294967280 }
   0xe   :  { %42 = sfence }
   0xf   :  { %v48_v0 = vld [vmem:[%s2644_s0 + $0x24] sm:$0xff]  ;;  %s1412_s12 = sld [smem:[#allocation3 + $0x1]]  ;;  %v1913_v2 = vld [vmem:[%s2644_s0 + $0x2c] sm:$0xff]  ;;  %v1635_v10 = vld [vmem:[%s2647_s3 + $0x114] ss:$8 sps:$4 sm:$0xff]   ;;  %s1413_s24 = sld [smem:[#allocation3 + $0x2]] }
  0x10   :  { %v44_v1 = vld [vmem:[%s2644_s0 + $0x8] sm:$0xff]  ;;  %v1918_v3 = vld [vmem:[%s2644_s0 + $0x10] sm:$0xff]  ;;  %v1920_v4 = vunpack.c.h.bf16 %v48_v0  ;;  %v1931_v8 = vunpack.c.l.bf16 %v1913_v2  ;;  %s1851_s29 = smov 127   ;;  %v1952_v16 = vunpack.c.l.bf16 %v48_v0  ;;  %s1414_s15 = sld [smem:[#allocation3 + $0x3]]  ;;  %v47_v44 = vld [vmem:[%s2644_s0 + $0x1c] sm:$0xff]  ;;  %vm140_vm0 = vcmask 1039360  }
  0x11   :  { %v1922_v5 = vunpack.c.h.bf16 %v44_v1  ;;  %v1632_v6 = vld [vmem:[%s2647_s3 + $0x104] ss:$8 sps:$4 sm:$0xff]   ;;  %v1634_v7 = vld [vmem:[%s2647_s3 + $0x100] ss:$8 sps:$4 sm:$0xff]   ;;  %v1934_v9 = vunpack.c.l.bf16 %v1918_v3  ;;  %v1637_v12 = vld [vmem:[%s2647_s3 + $0x110] ss:$8 sps:$4 sm:$0xff]   ;;  %v1955_v17 = vunpack.c.l.bf16 %v44_v1  ;;  %v2061_v54 = vunpack.c.h.bf16 %v47_v44 }
  0x12   :  { %1087 = vmatprep.subr.bf16.mxu0 %v1632_v6  ;;  %v1638_v15 = vld [vmem:[%s2647_s3 + $0x124] ss:$8 sps:$4 sm:$0xff]   ;;  %v1640_v20 = vld [vmem:[%s2647_s3 + $0x120] ss:$8 sps:$4 sm:$0xff]   ;;  %v1641_v21 = vld [vmem:[%s2647_s3 + $0x134] ss:$8 sps:$4 sm:$0xff]   ;;  %v2092_v1 = vunpack.c.l.bf16 %v47_v44 }
  0x13   :  { %1088 = vmatpush1.bf16.msra.mxu0 %v1634_v7  ;;  %v1643_v25 = vld [vmem:[%s2647_s3 + $0x130] ss:$8 sps:$4 sm:$0xff]   ;;  %v1644_v26 = vld [vmem:[%s2647_s3 + $0x144] ss:$8 sps:$4 sm:$0xff]   ;;  %v1646_v29 = vld [vmem:[%s2647_s3 + $0x140] ss:$8 sps:$4 sm:$0xff]  }
  0x14   :  { %1089 = vmatprep.subr.bf16.mxu0 %v1635_v10  ;;  %v1647_v30 = vld [vmem:[%s2647_s3 + $0x154] ss:$8 sps:$4 sm:$0xff]   ;;  %s1852_s20 = smov 100   ;;  %v1649_v33 = vld [vmem:[%s2647_s3 + $0x150] ss:$8 sps:$4 sm:$0xff]   ;;  %s65_s10 = sld [smem:[#allocation3]] }
  0x15   :  { %v1939_v11 = vstv %s1412_s12  ;;  %v1973_v24 = vstv %s1413_s24  ;;  %v1650_v34 = vld [vmem:[%s2647_s3 + $0x164] ss:$8 sps:$4 sm:$0xff]   ;;  %v1652_v35 = vld [vmem:[%s2647_s3 + $0x160] ss:$8 sps:$4 sm:$0xff]   ;;  %s1853_s18 = smov 99   ;;  %vm234_vm1 = vcmask 818176  }
  0x16   :  { %v94_v13 = vmul.f32 %v1939_v11, %v1920_v4  ;;  %v87_v14 = vmul.f32 %v1939_v11, %v1922_v5  ;;  %v95_v18 = vmul.f32 %v1939_v11, %v1931_v8  ;;  %v88_v19 = vmul.f32 %v1939_v11, %v1934_v9  ;;  %v1653_v39 = vld [vmem:[%s2647_s3 + $0x174] ss:$8 sps:$4 sm:$0xff]   ;;  %v1655_v40 = vld [vmem:[%s2647_s3 + $0x170] ss:$8 sps:$4 sm:$0xff]   ;;  %v1656_v43 = vld [vmem:[%s2647_s3 + $0x184] ss:$8 sps:$4 sm:$0xff]  }
  0x17   :  { %1090 = vmatpush1.bf16.msra.mxu0 %v1637_v12  ;;  %v93_v22 = vmul.f32 %v1939_v11, %v1952_v16  ;;  %v86_v23 = vmul.f32 %v1939_v11, %v1955_v17  ;;  %v182_v27 = vmul.f32 %v1973_v24, %v1934_v9  ;;  %v181_v28 = vmul.f32 %v1973_v24, %v1922_v5  ;;  %v43_v45 = vld [vmem:[%s2644_s0] sm:$0xff]  ;;  %v1659_v49 = vld [vmem:[%s2647_s3 + $0x194] ss:$8 sps:$4 sm:$0xff]   ;;  %v1661_v50 = vld [vmem:[%s2647_s3 + $0x190] ss:$8 sps:$4 sm:$0xff]   ;;  %s1855_s30 = smov 118  }
  0x18   :  { %132 = vrot.lane.b32.xlu1 %v94_v13, %s1851_s29  ;;  %118 = vrot.lane.b32.xlu0 %v87_v14, %s1851_s29  ;;  %v189_v31 = vmul.f32 %v1973_v24, %v1931_v8  ;;  %v188_v32 = vmul.f32 %v1973_v24, %v1920_v4  ;;  %v187_v36 = vmul.f32 %v1973_v24, %v1952_v16  ;;  %v2014_v38 = vstv %s1414_s15  ;;  %v1658_v46 = vld [vmem:[%s2647_s3 + $0x180] ss:$8 sps:$4 sm:$0xff]  }
  0x19   :  { %1091 = vmatprep.subr.bf16.mxu0 %v1638_v15  ;;  %v180_v37 = vmul.f32 %v1973_v24, %v1955_v17  ;;  %v276_v41 = vmul.f32 %v2014_v38, %v1934_v9  ;;  %v275_v42 = vmul.f32 %v2014_v38, %v1922_v5  ;;  %v283_v47 = vmul.f32 %v2014_v38, %v1931_v8  ;;  %v1664_v51 = vld [vmem:[%s2647_s3 + $0x4] ss:$8 sps:$4 sm:$0xff]   ;;  %v1667_v56 = vld [vmem:[%s2647_s3] ss:$8 sps:$4 sm:$0xff]   ;;  %v46_v59 = vld [vmem:[%s2644_s0 + $0x18] ss:$28 sps:$4 sm:$0xff]  }
  0x1a   :  { %v282_v48 = vmul.f32 %v2014_v38, %v1920_v4  ;;  %v281_v52 = vmul.f32 %v2014_v38, %v1952_v16  ;;  %v274_v53 = vmul.f32 %v2014_v38, %v1955_v17  ;;  %v2063_v55 = vunpack.c.h.bf16 %v43_v45  ;;  %1044 = vmatprep.subr.bf16.mxu1 %v1664_v51  ;;  %v1662_v58 = vld [vmem:[%s2647_s3 + $0x1a4] ss:$8 sps:$4 sm:$0xff]   ;;  %v1666_v60 = vld [vmem:[%s2647_s3 + $0x1a0] ss:$8 sps:$4 sm:$0xff]   ;;  %v1670_v62 = vld [vmem:[%s2647_s3 + $0x14] ss:$8 sps:$4 sm:$0xff]  }
  0x1b   :  { %1092 = vmatpush1.bf16.msra.mxu0 %v1640_v20  ;;  %v2068_v57 = vstv %s65_s10  ;;  %1045 = vmatpush1.bf16.msra.mxu1 %v1667_v56  ;;  %v92_v63 = vmul.f32 %v1939_v11, %v2061_v54  ;;  %v2094_v6 = vunpack.c.l.bf16 %v43_v45  ;;  %v1673_v7 = vld [vmem:[%s2647_s3 + $0x10] ss:$8 sps:$4 sm:$0xff]   ;;  %v1676_v13 = vld [vmem:[%s2647_s3 + $0x24] ss:$8 sps:$4 sm:$0xff]   ;;  %v91_v14 = vmul.f32 %v1939_v11, %v2092_v1  ;;  %v1703_v44 = vld [vmem:[%s2647_s3 + $0x60] ss:$8 sps:$4 sm:$0xff]  }
  0x1c   :  { %134 = vrot.lane.b32.xlu1 %v95_v18, %s1851_s29  ;;  %120 = vrot.lane.b32.xlu0 %v88_v19, %s1851_s29  ;;  %v2081_v61 = vmul.f32 %v2068_v57, %v1934_v9  ;;  %v85_v0 = vmul.f32 %v1939_v11, %v2063_v55  ;;  %v1668_v9 = vld [vmem:[%s2647_s3 + $0x1b4] ss:$8 sps:$4 sm:$0xff]   ;;  %v1672_v10 = vld [vmem:[%s2647_s3 + $0x1b0] ss:$8 sps:$4 sm:$0xff]   ;;  %v2107_v12 = vmul.f32 %v2068_v57, %v1931_v8  ;;  %v2118_v18 = vunpack.c.l.bf16 %v46_v59 }
  0x1d   :  { %1093 = vmatprep.subr.bf16.mxu0 %v1641_v21  ;;  %1046 = vmatprep.subr.bf16.mxu1 %v1670_v62  ;;  %v84_v15 = vmul.f32 %v1939_v11, %v2094_v6  ;;  %v2121_v19 = vunpack.c.h.bf16 %v1918_v3  ;;  %v1679_v8 = vld [vmem:[%s2647_s3 + $0x20] ss:$8 sps:$4 sm:$0xff]   ;;  %v1674_v20 = vld [vmem:[%s2647_s3 + $0x1c4] ss:$8 sps:$4 sm:$0xff]   ;;  %v1682_v3 = vld [vmem:[%s2647_s3 + $0x34] ss:$8 sps:$4 sm:$0xff]   ;;  %v280_v56 = vmul.f32 %v2014_v38, %v2061_v54  ;;  %v272_v62 = vmul.f32 %v2014_v38, %v2094_v6 }
  0x1e   :  { %v1678_v21 = vld [vmem:[%s2647_s3 + $0x1c0] ss:$8 sps:$4 sm:$0xff]   ;;  %v1700_v45 = vld [vmem:[%s2647_s3 + $0x204] ss:$8 sps:$4 sm:$0xff]   ;;  %vm328_vm2 = vcmask 809984   ;;  %vm1326_vm3 = vcmask 1041408  }
  0x1f   :  { %1094 = vmatpush1.bf16.msra.mxu0 %v1643_v25  ;;  %1047 = vmatpush1.bf16.msra.mxu1 %v1673_v7  ;;  %v2141_v25 = vunpack.c.h.bf16 %v46_v59  ;;  %v1721_v59 = vld [vmem:[%s2647_s3 + $0x90] ss:$8 sps:$4 sm:$0xff]   ;;  %v278_v7 = vmul.f32 %v2014_v38, %v2118_v18  ;;  %vm1854_vm4 = vmmov 1   ;;  %vm1319_vm6 = vcmask 80896  }
  0x20   :  { %130 = vrot.lane.b32.xlu1 %v93_v22, %s1851_s29  ;;  %116 = vrot.lane.b32.xlu0 %v86_v23, %s1851_s29  ;;  %v90_v22 = vmul.f32 %v1939_v11, %v2118_v18  ;;  %v89_v23 = vmul.f32 %v1939_v11, %v2121_v19  ;;  %vm1609_vm5 = vmpackc.low %vm1326_vm3, %vm1854_vm4 }
  0x21   :  { %1095 = vmatprep.subr.bf16.mxu0 %v1644_v26  ;;  %1048 = vmatprep.subr.bf16.mxu1 %v1676_v13  ;;  %v2144_v26 = vunpack.c.h.bf16 %v1913_v2  ;;  %v97_v2 = vmul.f32 %v1939_v11, %v2141_v25  ;;  %v1733_v13 = vld [vmem:[%s2647_s3 + $0xb0] ss:$8 sps:$4 sm:$0xff]  }
  0x23   :  { %1096 = vmatpush1.bf16.msra.mxu0 %v1646_v29  ;;  %1049 = vmatpush1.bf16.msra.mxu1 %v1679_v8  ;;  %v1688_v29 = vld [vmem:[%s2647_s3 + $0x44] ss:$8 sps:$4 sm:$0xff]   ;;  %v190_v51 = vmul.f32 %v1973_v24, %v2144_v26  ;;  %v1739_v8 = vld [vmem:[%s2647_s3 + $0xc0] ss:$8 sps:$4 sm:$0xff]  }
  0x24   :  { %214 = vrot.lane.b32.xlu1 %v182_v27, %s1852_s20  ;;  %212 = vrot.lane.b32.xlu0 %v181_v28, %s1852_s20  ;;  %v1685_v27 = vld [vmem:[%s2647_s3 + $0x30] ss:$8 sps:$4 sm:$0xff]   ;;  %v1680_v28 = vld [vmem:[%s2647_s3 + $0x1d4] ss:$8 sps:$4 sm:$0xff]  }
  0x25   :  { %1097 = vmatprep.subr.bf16.mxu0 %v1647_v30  ;;  %1050 = vmatprep.subr.bf16.mxu1 %v1682_v3  ;;  %v96_v30 = vmul.f32 %v1939_v11, %v2144_v26  ;;  %v1694_v11 = vld [vmem:[%s2647_s3 + $0x54] ss:$8 sps:$4 sm:$0xff]   ;;  %v1751_v3 = vld [vmem:[%s2647_s3 + $0xe0] ss:$8 sps:$4 sm:$0xff]  }
  0x27   :  { %1098 = vmatpush1.bf16.msra.mxu0 %v1649_v33  ;;  %1051 = vmatpush1.bf16.msra.mxu1 %v1685_v27  ;;  %v1686_v33 = vld [vmem:[%s2647_s3 + $0x1e4] ss:$8 sps:$4 sm:$0xff]  }
  0x28   :  { %228 = vrot.lane.b32.xlu1 %v189_v31, %s1852_s20  ;;  %226 = vrot.lane.b32.xlu0 %v188_v32, %s1852_s20  ;;  %v1691_v31 = vld [vmem:[%s2647_s3 + $0x40] ss:$8 sps:$4 sm:$0xff]   ;;  %v1684_v32 = vld [vmem:[%s2647_s3 + $0x1d0] ss:$8 sps:$4 sm:$0xff]  }
  0x29   :  { %1099 = vmatprep.subr.bf16.mxu0 %v1650_v34  ;;  %1052 = vmatprep.subr.bf16.mxu1 %v1688_v29  ;;  %v186_v34 = vmul.f32 %v1973_v24, %v2061_v54 }
  0x2b   :  { %1100 = vmatpush1.bf16.msra.mxu0 %v1652_v35  ;;  %1053 = vmatpush1.bf16.msra.mxu1 %v1691_v31  ;;  %v179_v35 = vmul.f32 %v1973_v24, %v2063_v55 }
  0x2c   :  { %224 = vrot.lane.b32.xlu1 %v187_v36, %s1852_s20  ;;  %210 = vrot.lane.b32.xlu0 %v180_v37, %s1852_s20  ;;  %v1697_v36 = vld [vmem:[%s2647_s3 + $0x50] ss:$8 sps:$4 sm:$0xff]   ;;  %v1690_v37 = vld [vmem:[%s2647_s3 + $0x1e0] ss:$8 sps:$4 sm:$0xff]  }
  0x2d   :  { %1101 = vmatprep.subr.bf16.mxu0 %v1653_v39  ;;  %1054 = vmatprep.subr.bf16.mxu1 %v1694_v11  ;;  %v1692_v39 = vld [vmem:[%s2647_s3 + $0x1f4] ss:$8 sps:$4 sm:$0xff]  }
  0x2f   :  { %1102 = vmatpush1.bf16.msra.mxu0 %v1655_v40  ;;  %1055 = vmatpush1.bf16.msra.mxu1 %v1697_v36  ;;  %v1701_v40 = vld [vmem:[%s2647_s3 + $0x64] ss:$8 sps:$4 sm:$0xff]  }
  0x30   :  { %308 = vrot.lane.b32.xlu1 %v276_v41, %s1853_s18  ;;  %306 = vrot.lane.b32.xlu0 %v275_v42, %s1853_s18  ;;  %v185_v41 = vmul.f32 %v1973_v24, %v2092_v1  ;;  %v178_v42 = vmul.f32 %v1973_v24, %v2094_v6 }
  0x31   :  { %1103 = vmatprep.subr.bf16.mxu0 %v1656_v43  ;;  %v1696_v43 = vld [vmem:[%s2647_s3 + $0x1f0] ss:$8 sps:$4 sm:$0xff]   ;;  %1056 = vmatprep.subr.bf16.mxu1 %v1701_v40  ;;  %v80_v40 = vmul.f32 %v2068_v57, %v1920_v4 }
  0x33   :  { %1104 = vmatpush1.bf16.msra.mxu0 %v1658_v46  ;;  %1057 = vmatpush1.bf16.msra.mxu1 %v1703_v44  ;;  %v184_v46 = vmul.f32 %v1973_v24, %v2118_v18  ;;  %v1737_v18 = vld [vmem:[%s2647_s3 + $0xc4] ss:$8 sps:$4 sm:$0xff]  }
  0x34   :  { %322 = vrot.lane.b32.xlu1 %v283_v47, %s1853_s18  ;;  %320 = vrot.lane.b32.xlu0 %v282_v48, %s1853_s18  ;;  %v183_v47 = vmul.f32 %v1973_v24, %v2121_v19  ;;  %v1707_v48 = vld [vmem:[%s2647_s3 + $0x74] ss:$8 sps:$4 sm:$0xff]  }
  0x35   :  { %1105 = vmatprep.subr.bf16.mxu0 %v1659_v49  ;;  %v1709_v49 = vld [vmem:[%s2647_s3 + $0x70] ss:$8 sps:$4 sm:$0xff]   ;;  %1058 = vmatprep.subr.bf16.mxu1 %v1707_v48  ;;  %v79_v48 = vmul.f32 %v2068_v57, %v1952_v16 }
  0x37   :  { %1106 = vmatpush1.bf16.msra.mxu0 %v1661_v50  ;;  %1059 = vmatpush1.bf16.msra.mxu1 %v1709_v49  ;;  %v191_v50 = vmul.f32 %v1973_v24, %v2141_v25  ;;  %v273_v24 = vmul.f32 %v2014_v38, %v2063_v55  ;;  %v73_v49 = vmul.f32 %v2068_v57, %v1955_v17 }
  0x38   :  { %318 = vrot.lane.b32.xlu1 %v281_v52, %s1853_s18  ;;  %304 = vrot.lane.b32.xlu0 %v274_v53, %s1853_s18  ;;  %v1713_v52 = vld [vmem:[%s2647_s3 + $0x84] ss:$8 sps:$4 sm:$0xff]   ;;  %v1715_v53 = vld [vmem:[%s2647_s3 + $0x80] ss:$8 sps:$4 sm:$0xff]  }
  0x39   :  { %1107 = vmatprep.subr.bf16.mxu0 %v1662_v58  ;;  %1060 = vmatprep.subr.bf16.mxu1 %v1713_v52  ;;  %v1719_v58 = vld [vmem:[%s2647_s3 + $0x94] ss:$8 sps:$4 sm:$0xff]  }
  0x3b   :  { %1108 = vmatpush1.bf16.msra.mxu0 %v1666_v60  ;;  %1061 = vmatpush1.bf16.msra.mxu1 %v1715_v53  ;;  %v279_v60 = vmul.f32 %v2014_v38, %v2092_v1 }
  0x3c   :  { %128 = vrot.lane.b32.xlu1 %v92_v63, %s1851_s29  ;;  %114 = vrot.lane.b32.xlu0 %v85_v0, %s1851_s29  ;;  %v1725_v63 = vld [vmem:[%s2647_s3 + $0xa4] ss:$8 sps:$4 sm:$0xff]   ;;  %v1727_v0 = vld [vmem:[%s2647_s3 + $0xa0] ss:$8 sps:$4 sm:$0xff]  }
  0x3d   :  { %1109 = vmatprep.subr.bf16.mxu0 %v1668_v9  ;;  %1062 = vmatprep.subr.bf16.mxu1 %v1719_v58  ;;  %v277_v9 = vmul.f32 %v2014_v38, %v2121_v19 }
  0x3f   :  { %1110 = vmatpush1.bf16.msra.mxu0 %v1672_v10  ;;  %1063 = vmatpush1.bf16.msra.mxu1 %v1721_v59  ;;  %v1731_v10 = vld [vmem:[%s2647_s3 + $0xb4] ss:$8 sps:$4 sm:$0xff]  }
  0x40   :  { %126 = vrot.lane.b32.xlu1 %v91_v14, %s1851_s29  ;;  %112 = vrot.lane.b32.xlu0 %v84_v15, %s1851_s29  ;;  %v285_v14 = vmul.f32 %v2014_v38, %v2141_v25  ;;  %v284_v15 = vmul.f32 %v2014_v38, %v2144_v26  ;;  %v1745_v38 = vld [vmem:[%s2647_s3 + $0xd0] ss:$8 sps:$4 sm:$0xff]  }
  0x41   :  { %1111 = vmatprep.subr.bf16.mxu0 %v1674_v20  ;;  %1064 = vmatprep.subr.bf16.mxu1 %v1725_v63  ;;  %v1743_v20 = vld [vmem:[%s2647_s3 + $0xd4] ss:$8 sps:$4 sm:$0xff]  }
  0x43   :  { %1112 = vmatpush1.bf16.msra.mxu0 %v1678_v21  ;;  %1065 = vmatpush1.bf16.msra.mxu1 %v1727_v0  ;;  %v1749_v21 = vld [vmem:[%s2647_s3 + $0xe4] ss:$8 sps:$4 sm:$0xff]  }
  0x44   :  { %124 = vrot.lane.b32.xlu1 %v90_v22, %s1851_s29  ;;  %122 = vrot.lane.b32.xlu0 %v89_v23, %s1851_s29  ;;  %v1755_v22 = vld [vmem:[%s2647_s3 + $0xf4] ss:$8 sps:$4 sm:$0xff]   ;;  %v1757_v23 = vld [vmem:[%s2647_s3 + $0xf0] ss:$8 sps:$4 sm:$0xff]  }
  0x45   :  { %1113 = vmatprep.subr.bf16.mxu0 %v1680_v28  ;;  %1066 = vmatprep.subr.bf16.mxu1 %v1731_v10 }
  0x47   :  { %1114 = vmatpush1.bf16.msra.mxu0 %v1684_v32  ;;  %1067 = vmatpush1.bf16.msra.mxu1 %v1733_v13 }
  0x48   :  { %138 = vrot.lane.b32.xlu1 %v97_v2, %s1851_s29  ;;  %136 = vrot.lane.b32.xlu0 %v96_v30, %s1851_s29 }
  0x49   :  { %1115 = vmatprep.subr.bf16.mxu0 %v1686_v33  ;;  %1068 = vmatprep.subr.bf16.mxu1 %v1737_v18 }
  0x4b   :  { %1116 = vmatpush1.bf16.msra.mxu0 %v1690_v37  ;;  %1069 = vmatpush1.bf16.msra.mxu1 %v1739_v8 }
  0x4c   :  { %222 = vrot.lane.b32.xlu1 %v186_v34, %s1852_s20  ;;  %208 = vrot.lane.b32.xlu0 %v179_v35, %s1852_s20  ;;  %v74_v34 = vmul.f32 %v2068_v57, %v1922_v5 }
  0x4d   :  { %1117 = vmatprep.subr.bf16.mxu0 %v1692_v39  ;;  %1070 = vmatprep.subr.bf16.mxu1 %v1743_v20 }
  0x4f   :  { %1118 = vmatpush1.bf16.msra.mxu0 %v1696_v43  ;;  %1071 = vmatpush1.bf16.msra.mxu1 %v1745_v38 }
  0x50   :  { %220 = vrot.lane.b32.xlu1 %v185_v41, %s1852_s20  ;;  %206 = vrot.lane.b32.xlu0 %v178_v42, %s1852_s20 }
  0x51   :  { %1130 = vmatprep.subr.bf16.mxu0 %v1700_v45  ;;  %1072 = vmatprep.subr.bf16.mxu1 %v1749_v21 }
  0x53   :  { %1073 = vmatpush1.bf16.msra.mxu1 %v1751_v3 }
  0x54   :  { %218 = vrot.lane.b32.xlu1 %v184_v46, %s1852_s20  ;;  %216 = vrot.lane.b32.xlu0 %v183_v47, %s1852_s20  ;;  %v2331_v46 = vstv %s2646_s2 }
  0x55   :  { %1074 = vmatprep.subr.bf16.mxu1 %v1755_v22 }
  0x57   :  { %1075 = vmatpush1.bf16.msra.mxu1 %v1757_v23 }
  0x58   :  { %232 = vrot.lane.b32.xlu1 %v191_v50, %s1852_s20  ;;  %230 = vrot.lane.b32.xlu0 %v190_v51, %s1852_s20 }
  0x5c   :  { %316 = vrot.lane.b32.xlu1 %v280_v56, %s1853_s18  ;;  %302 = vrot.lane.b32.xlu0 %v273_v24, %s1853_s18 }
  0x60   :  { %314 = vrot.lane.b32.xlu1 %v279_v60, %s1853_s18  ;;  %300 = vrot.lane.b32.xlu0 %v272_v62, %s1853_s18 }
  0x64   :  { %312 = vrot.lane.b32.xlu1 %v278_v7, %s1853_s18  ;;  %310 = vrot.lane.b32.xlu0 %v277_v9, %s1853_s18 }
  0x68   :  { %326 = vrot.lane.b32.xlu1 %v285_v14, %s1853_s18  ;;  %324 = vrot.lane.b32.xlu0 %v284_v15, %s1853_s18 }
  0x8a   :  { %v133_v25 = vpop.permute.xlu1 %132  ;;  %v119_v27 = vpop.permute.xlu0 %118 }
  0x8e   :  { %v2298_v28 = vpop.permute.xlu1 %134  ;;  %v2300_v29 = vpop.permute.xlu0 %120 }
  0x8f   :  { %v144_v35 = vsel %vm140_vm0, %v119_v27, %v2300_v29  ;;  %v150_v42 = vsel %vm140_vm0, %v133_v25, %v2298_v28 }
  0x90   :  { %v168_v41 = vadd.f32 %v144_v35, %v74_v34  ;;  %v174_v47 = vadd.f32 %v150_v42, %v80_v40 }
  0x92   :  { %v2302_v2 = vpop.permute.xlu1 %130  ;;  %v2304_v30 = vpop.permute.xlu0 %116 }
  0x93   :  { %v149_v51 = vsel %vm140_vm0, %v2302_v2, %v133_v25  ;;  %v143_v52 = vsel %vm140_vm0, %v2304_v30, %v119_v27 }
  0x94   :  { %v173_v60 = vadd.f32 %v149_v51, %v79_v48  ;;  %v167_v62 = vadd.f32 %v143_v52, %v73_v49 }
  0x96   :  { %v2306_v31 = vpop.permute.xlu1 %214  ;;  %v213_v32 = vpop.permute.xlu0 %212 }
  0x97   :  { %v238_v39 = vsel %vm234_vm1, %v213_v32, %v2306_v31 }
  0x98   :  { %v262_v5 = vadd.f32 %v238_v39, %v168_v41 }
  0x9a   :  { %v2308_v33 = vpop.permute.xlu1 %228  ;;  %v227_v11 = vpop.permute.xlu0 %226 }
  0x9b   :  { %v244_v45 = vsel %vm234_vm1, %v227_v11, %v2308_v33 }
  0x9c   :  { %v268_v53 = vadd.f32 %v244_v45, %v174_v47 }
  0x9e   :  { %v2314_v36 = vpop.permute.xlu1 %224  ;;  %v2316_v37 = vpop.permute.xlu0 %210 }
  0x9f   :  { %v243_v59 = vsel %vm234_vm1, %v2314_v36, %v227_v11  ;;  %v237_v16 = vsel %vm234_vm1, %v2316_v37, %v213_v32 }
  0xa0   :  { %v267_v7 = vadd.f32 %v243_v59, %v173_v60  ;;  %v261_v9 = vadd.f32 %v237_v16, %v167_v62  ;;  %v72_v62 = vmul.f32 %v2068_v57, %v2063_v55  ;;  %v1698_v55 = vld [vmem:[%s2647_s3 + $0x200] ss:$8 sps:$4 sm:$0xff]  }
  0xa2   :  { %v2324_v43 = vpop.permute.xlu1 %308  ;;  %v307_v44 = vpop.permute.xlu0 %306 }
  0xa3   :  { %v332_v4 = vsel %vm328_vm2, %v307_v44, %v2324_v43 }
  0xa4   :  { %v356_v50 = vadd.f32 %v332_v4, %v262_v5 }
  0xa6   :  { %v369_v56 = vadd.f32 %v2331_v46, %v356_v50  ;;  %v2344_v24 = vpop.permute.xlu1 %322  ;;  %v321_v58 = vpop.permute.xlu0 %320 }
  0xa7   :  { %v338_v17 = vsel %vm328_vm2, %v321_v58, %v2344_v24 }
  0xa8   :  { %v1418_v63 = vmul.f32 -1.442695, %v369_v56  ;;  %v362_v0 = vadd.f32 %v338_v17, %v268_v53 }
  0xaa   :  { %1776 = vpow2.f32 %v1418_v63  ;;  %v375_v10 = vadd.f32 %v2331_v46, %v362_v0  ;;  %v2353_v13 = vpop.permute.xlu1 %318  ;;  %v2355_v14 = vpop.permute.xlu0 %304 }
  0xab   :  { %v337_v15 = vsel %vm328_vm2, %v2353_v13, %v321_v58  ;;  %v331_v18 = vsel %vm328_vm2, %v2355_v14, %v307_v44 }
  0xac   :  { %v1424_v8 = vmul.f32 -1.442695, %v375_v10  ;;  %v361_v20 = vadd.f32 %v337_v15, %v267_v7  ;;  %v355_v38 = vadd.f32 %v331_v18, %v261_v9 }
  0xae   :  { %1778 = vpow2.f32 %v1424_v8  ;;  %v374_v21 = vadd.f32 %v2331_v46, %v361_v20  ;;  %v368_v3 = vadd.f32 %v2331_v46, %v355_v38  ;;  %v129_v22 = vpop.permute.xlu1 %128  ;;  %v115_v23 = vpop.permute.xlu0 %114 }
  0xaf   :  { %v148_v7 = vsel %vm140_vm0, %v129_v22, %v2302_v2  ;;  %v142_v9 = vsel %vm140_vm0, %v115_v23, %v2304_v30 }
  0xb0   :  { %v1423_v25 = vmul.f32 -1.442695, %v374_v21  ;;  %v1417_v27 = vmul.f32 -1.442695, %v368_v3  ;;  %v166_v38 = vadd.f32 %v142_v9, %v72_v62  ;;  %v71_v21 = vmul.f32 %v2068_v57, %v2094_v6  ;;  %v1704_v6 = vld [vmem:[%s2647_s3 + $0x210] ss:$8 sps:$4 sm:$0xff]  }
  0xb1   :  { %v1716_v62 = vld [vmem:[%s2647_s3 + $0x230] ss:$8 sps:$4 sm:$0xff]  }
  0xb2   :  { %1780 = vpow2.f32 %v1423_v25  ;;  %v127_v32 = vpop.permute.xlu1 %126  ;;  %v113_v11 = vpop.permute.xlu0 %112 }
  0xb3   :  { %1782 = vpow2.f32 %v1417_v27  ;;  %v141_v25 = vsel %vm140_vm0, %v113_v11, %v115_v23 }
  0xb4   :  { %v1777_v34 = vpop.eup %1776 }
  0xb5   :  { %v417_v35 = vadd.f32 1.0, %v1777_v34 }
  0xb6   :  { %v125_v39 = vpop.permute.xlu1 %124  ;;  %v123_v40 = vpop.permute.xlu0 %122 }
  0xb7   :  { %v145_v41 = vsel %vm140_vm0, %v2300_v29, %v123_v40  ;;  %1784 = vrcp.f32 %v417_v35 }
  0xb8   :  { %v1779_v42 = vpop.eup %1778  ;;  %v169_v5 = vadd.f32 %v145_v41, %v2081_v61 }
  0xb9   :  { %v423_v44 = vadd.f32 1.0, %v1779_v42 }
  0xba   :  { %v2366_v45 = vpop.permute.xlu1 %138  ;;  %v2368_v4 = vpop.permute.xlu0 %136 }
  0xbb   :  { %1786 = vrcp.f32 %v423_v44  ;;  %v151_v47 = vsel %vm140_vm0, %v2298_v28, %v2368_v4 }
  0xbc   :  { %v1781_v48 = vpop.eup %1780  ;;  %v175_v49 = vadd.f32 %v151_v47, %v2107_v12  ;;  %v78_v12 = vmul.f32 %v2068_v57, %v2061_v54  ;;  %v82_v47 = vmul.f32 %v2068_v57, %v2144_v26 }
  0xbd   :  { %v1783_v50 = vpop.eup %1782  ;;  %v422_v51 = vadd.f32 1.0, %v1781_v48 }
  0xbe   :  { %v416_v29 = vadd.f32 1.0, %v1783_v50  ;;  %v223_v52 = vpop.permute.xlu1 %222  ;;  %v209_v53 = vpop.permute.xlu0 %208  ;;  %v172_v20 = vadd.f32 %v148_v7, %v78_v12 }
  0xbf   :  { %1788 = vrcp.f32 %v422_v51  ;;  %v242_v18 = vsel %vm234_vm1, %v223_v52, %v2314_v36  ;;  %v236_v2 = vsel %vm234_vm1, %v209_v53, %v2316_v37  ;;  %v147_v36 = vsel %vm140_vm0, %v127_v32, %v129_v22  ;;  %v1712_v32 = vld [vmem:[%s2647_s3 + $0x224] ss:$8 sps:$4 sm:$0xff]  }
  0xc0   :  { %1790 = vrcp.f32 %v416_v29  ;;  %v76_v37 = vmul.f32 %v2068_v57, %v2121_v19  ;;  %v266_v27 = vadd.f32 %v242_v18, %v172_v20  ;;  %v260_v34 = vadd.f32 %v236_v2, %v166_v38  ;;  %v1730_v38 = vld [vmem:[%s2647_s3 + $0x254] ss:$8 sps:$4 sm:$0xff]  }
  0xc1   :  { %v1785_v58 = vpop.eup %1784 }
  0xc2   :  { %v221_v61 = vpop.permute.xlu1 %220  ;;  %v207_v56 = vpop.permute.xlu0 %206 }
  0xc3   :  { %v241_v42 = vsel %vm234_vm1, %v221_v61, %v223_v52  ;;  %v235_v22 = vsel %vm234_vm1, %v207_v56, %v209_v53  ;;  %v1710_v52 = vld [vmem:[%s2647_s3 + $0x220] ss:$8 sps:$4 sm:$0xff]  }
  0xc5   :  { %v1787_v59 = vpop.eup %1786 }
  0xc6   :  { %v219_v16 = vpop.permute.xlu1 %218  ;;  %v217_v17 = vpop.permute.xlu0 %216  ;;  %v453_v60 = vpack.c.bf16 %v1787_v59, %v1785_v58 }
  0xc7   :  { %v239_v28 = vsel %vm234_vm1, %v2306_v31, %v217_v17  ;;  %v77_v31 = vmul.f32 %v2068_v57, %v2092_v1  ;;  %v1706_v1 = vld [vmem:[%s2647_s3 + $0x214] ss:$8 sps:$4 sm:$0xff]   ;;  %v240_v53 = vsel %vm234_vm1, %v217_v17, %v219_v16 }
  0xc8   :  { %v2380_v63 = vadd.f32 %v239_v28, %v169_v5  ;;  %1119 = vmatprep.mubr.bf16.mxu0 %v453_v60 }
  0xc9   :  { %v1789_v0 = vpop.eup %1788  ;;  %v171_v11 = vadd.f32 %v147_v36, %v77_v31 }
  0xca   :  { %v1791_v10 = vpop.eup %1790  ;;  %v2388_v15 = vpop.permute.xlu1 %232 }
  0xcb   :  { %v231_v54 = vpop.permute.xlu0 %230  ;;  %v452_v8 = vpack.c.bf16 %v1789_v0, %v1791_v10  ;;  %v265_v48 = vadd.f32 %v241_v42, %v171_v11  ;;  %v1724_v10 = vld [vmem:[%s2647_s3 + $0x244] ss:$8 sps:$4 sm:$0xff]  }
  0xcc   :  { %v245_v30 = vsel %vm234_vm1, %v2308_v33, %v231_v54  ;;  %v146_v33 = vsel %vm140_vm0, %v123_v40, %v125_v39  ;;  %v165_v39 = vadd.f32 %v141_v25, %v71_v21  ;;  %v246_v0 = vsel %vm234_vm1, %v231_v54, %v2388_v15 }
  0xcd   :  { %v2404_v3 = vadd.f32 %v245_v30, %v175_v49  ;;  %1120 = vmatmul.mubr.bf16.vlgmr.msra.gmra.mrb[0].mxu0 %v452_v8  ;;  %v170_v44 = vadd.f32 %v146_v33, %v76_v37 }
  0xce   :  { %1131 = vmatpush1.bf16.msra.mxu0 %v1698_v55  ;;  %v317_v35 = vpop.permute.xlu1 %316  ;;  %v259_v49 = vadd.f32 %v235_v22, %v165_v39 }
  0xcf   :  { %v303_v41 = vpop.permute.xlu0 %302  ;;  %v336_v23 = vsel %vm328_vm2, %v317_v35, %v2353_v13  ;;  %1132 = vmatprep.subr.bf16.mxu0 %v1706_v1  ;;  %v152_v13 = vsel %vm140_vm0, %v2368_v4, %v2366_v45  ;;  %v1718_v45 = vld [vmem:[%s2647_s3 + $0x234] ss:$8 sps:$4 sm:$0xff]   ;;  %v264_v60 = vadd.f32 %v240_v53, %v170_v44  ;;  %v1722_v1 = vld [vmem:[%s2647_s3 + $0x240] ss:$8 sps:$4 sm:$0xff]   ;;  %v1752_v53 = vld [vmem:[%s2647_s3 + $0x290] ss:$8 sps:$4 sm:$0xff]  }
  0xd0   :  { %v330_v19 = vsel %vm328_vm2, %v303_v41, %v2355_v14  ;;  %v360_v40 = vadd.f32 %v336_v23, %v266_v27  ;;  %v176_v59 = vadd.f32 %v152_v13, %v82_v47  ;;  %v1742_v23 = vld [vmem:[%s2647_s3 + $0x274] ss:$8 sps:$4 sm:$0xff]  }
  0xd1   :  { %v354_v5 = vadd.f32 %v330_v19, %v260_v34  ;;  %v1736_v34 = vld [vmem:[%s2647_s3 + $0x264] ss:$8 sps:$4 sm:$0xff]  }
  0xd2   :  { %v373_v14 = vadd.f32 %v2331_v46, %v360_v40  ;;  %1133 = vmatpush1.bf16.msra.mxu0 %v1704_v6  ;;  %v315_v51 = vpop.permute.xlu1 %314  ;;  %v270_v30 = vadd.f32 %v246_v0, %v176_v59  ;;  %v1740_v40 = vld [vmem:[%s2647_s3 + $0x270] ss:$8 sps:$4 sm:$0xff]  }
  0xd3   :  { %v367_v50 = vadd.f32 %v2331_v46, %v354_v5  ;;  %v301_v29 = vpop.permute.xlu0 %300  ;;  %v335_v57 = vsel %vm328_vm2, %v315_v51, %v317_v35  ;;  %1134 = vmatprep.subr.bf16.mxu0 %v1712_v32  ;;  %v1748_v5 = vld [vmem:[%s2647_s3 + $0x284] ss:$8 sps:$4 sm:$0xff]  }
  0xd4   :  { %v329_v26 = vsel %vm328_vm2, %v301_v29, %v303_v41  ;;  %v1422_v4 = vmul.f32 -1.442695, %v373_v14  ;;  %v359_v56 = vadd.f32 %v335_v57, %v265_v48  ;;  %v1746_v48 = vld [vmem:[%s2647_s3 + $0x280] ss:$8 sps:$4 sm:$0xff]  }
  0xd5   :  { %v1416_v61 = vmul.f32 -1.442695, %v367_v50  ;;  %v353_v58 = vadd.f32 %v329_v26, %v259_v49  ;;  %v1754_v49 = vld [vmem:[%s2647_s3 + $0x294] ss:$8 sps:$4 sm:$0xff]  }
  0xd6   :  { %1792 = vpow2.f32 %v1422_v4  ;;  %v372_v28 = vadd.f32 %v2331_v46, %v359_v56  ;;  %1135 = vmatpush1.bf16.msra.mxu0 %v1710_v52  ;;  %v313_v17 = vpop.permute.xlu1 %312 }
  0xd7   :  { %v366_v16 = vadd.f32 %v2331_v46, %v353_v58  ;;  %v311_v12 = vpop.permute.xlu0 %310  ;;  %1794 = vpow2.f32 %v1416_v61  ;;  %1136 = vmatprep.subr.bf16.mxu0 %v1718_v45  ;;  %v1760_v45 = vld [vmem:[%s2647_s3 + $0x2a4] ss:$8 sps:$4 sm:$0xff]   ;;  %v1758_v58 = vld [vmem:[%s2647_s3 + $0x2a0] ss:$8 sps:$4 sm:$0xff]  }
  0xd8   :  { %v333_v7 = vsel %vm328_vm2, %v2324_v43, %v311_v12  ;;  %v334_v9 = vsel %vm328_vm2, %v311_v12, %v313_v17  ;;  %v1421_v31 = vmul.f32 -1.442695, %v372_v28  ;;  %v1761_v28 = vld [vmem:[%s2647_s3 + $0x2b0] ss:$8 sps:$4 sm:$0xff]  }
  0xd9   :  { %v1415_v55 = vmul.f32 -1.442695, %v366_v16  ;;  %v357_v18 = vadd.f32 %v333_v7, %v2380_v63  ;;  %v358_v2 = vadd.f32 %v334_v9, %v264_v60  ;;  %v1763_v60 = vld [vmem:[%s2647_s3 + $0x2b4] ss:$8 sps:$4 sm:$0xff]   ;;  %v1766_v16 = vld [vmem:[%s2647_s3 + $0x2c4] ss:$8 sps:$4 sm:$0xff]  }
  0xda   :  { %1796 = vpow2.f32 %v1421_v31  ;;  %1137 = vmatpush1.bf16.msra.mxu0 %v1716_v62  ;;  %v327_v43 = vpop.permute.xlu1 %326  ;;  %v1764_v62 = vld [vmem:[%s2647_s3 + $0x2c0] ss:$8 sps:$4 sm:$0xff]   ;;  %v1769_v9 = vld [vmem:[%s2647_s3 + $0x2d4] ss:$8 sps:$4 sm:$0xff]  }
  0xdb   :  { %v370_v15 = vadd.f32 %v2331_v46, %v357_v18  ;;  %v371_v54 = vadd.f32 %v2331_v46, %v358_v2  ;;  %v325_v8 = vpop.permute.xlu0 %324  ;;  %1798 = vpow2.f32 %v1415_v55  ;;  %1138 = vmatprep.subr.bf16.mxu0 %v1724_v10  ;;  %v1767_v55 = vld [vmem:[%s2647_s3 + $0x2d0] ss:$8 sps:$4 sm:$0xff]   ;;  %v1772_v18 = vld [vmem:[%s2647_s3 + $0x2e4] ss:$8 sps:$4 sm:$0xff]   ;;  %v1770_v2 = vld [vmem:[%s2647_s3 + $0x2e0] ss:$8 sps:$4 sm:$0xff]  }
  0xdc   :  { %v339_v20 = vsel %vm328_vm2, %v2344_v24, %v325_v8  ;;  %v340_v63 = vsel %vm328_vm2, %v325_v8, %v327_v43  ;;  %v1728_v24 = vld [vmem:[%s2647_s3 + $0x250] ss:$8 sps:$4 sm:$0xff]   ;;  %v1208_v43 = vld [vmem:[%s2649_s5 + $0x88] sm:$0xff]  ;;  %v1191_v8 = vld [vmem:[%s2649_s5] sm:$0xff] }
  0xdd   :  { %v1419_v21 = vmul.f32 -1.442695, %v370_v15  ;;  %v1420_v36 = vmul.f32 -1.442695, %v371_v54  ;;  %v363_v25 = vadd.f32 %v339_v20, %v2404_v3  ;;  %v364_v37 = vadd.f32 %v340_v63, %v270_v30  ;;  %v1775_v30 = vld [vmem:[%s2647_s3 + $0x2f4] ss:$8 sps:$4 sm:$0xff]  }
  0xde   :  { %1139 = vmatpush1.bf16.msra.mxu0 %v1722_v1  ;;  %v1773_v15 = vld [vmem:[%s2647_s3 + $0x2f0] ss:$8 sps:$4 sm:$0xff]   ;;  %v1207_v54 = vld [vmem:[%s2649_s5 + $0x80] sm:$0xff]  ;;  %v1192_v20 = vld [vmem:[%s2649_s5 + $0x8] sm:$0xff] }
  0xdf   :  { %1800 = vpow2.f32 %v1419_v21  ;;  %v376_v33 = vadd.f32 %v2331_v46, %v363_v25  ;;  %v377_v27 = vadd.f32 %v2331_v46, %v364_v37  ;;  %1140 = vmatprep.subr.bf16.mxu0 %v1730_v38  ;;  %v1734_v46 = vld [vmem:[%s2647_s3 + $0x260] ss:$8 sps:$4 sm:$0xff]   ;;  %v1576_v1 = vpack.c.bf16 %v1208_v43, %v1207_v54  ;;  %v1209_v63 = vld [vmem:[%s2649_s5 + $0x90] sm:$0xff]  ;;  %v1210_v38 = vld [vmem:[%s2649_s5 + $0x98] sm:$0xff] }
  0xe0   :  { %v1793_v35 = vpop.eup %1792  ;;  %1802 = vpow2.f32 %v1420_v36  ;;  %v1578_v21 = vpack.c.bf16 %v1192_v20, %v1191_v8  ;;  %v1580_v36 = vpack.c.bf16 %v1210_v38, %v1209_v63  ;;  %v1193_v25 = vld [vmem:[%s2649_s5 + $0x10] sm:$0xff]  ;;  %v1194_v37 = vld [vmem:[%s2649_s5 + $0x18] sm:$0xff]  ;;  %v1203_v54 = vld [vmem:[%s2649_s5 + $0x60] sm:$0xff] }
  0xe1   :  { %v1425_v41 = vmul.f32 -1.442695, %v376_v33  ;;  %v1795_v3 = vpop.eup %1794  ;;  %v421_v6 = vadd.f32 1.0, %v1793_v35  ;;  %v1426_v42 = vmul.f32 -1.442695, %v377_v27  ;;  %v1211_v33 = vld [vmem:[%s2649_s5 + $0xa0] sm:$0xff]  ;;  %1577 = vmatprep.subr.bf16.mxu1 %v1576_v1 }
  0xe2   :  { %v415_v22 = vadd.f32 1.0, %v1795_v3  ;;  %1141 = vmatpush1.bf16.msra.mxu0 %v1728_v24  ;;  %v1212_v27 = vld [vmem:[%s2649_s5 + $0xa8] sm:$0xff]  ;;  %v1582_v24 = vpack.c.bf16 %v1194_v37, %v1193_v25  ;;  %v1195_v35 = vld [vmem:[%s2649_s5 + $0x20] sm:$0xff]  ;;  %v1213_v3 = vld [vmem:[%s2649_s5 + $0xb0] sm:$0xff] }
  0xe3   :  { %1804 = vpow2.f32 %v1425_v41  ;;  %1142 = vmatprep.subr.bf16.mxu0 %v1736_v34  ;;  %v1584_v34 = vpack.c.bf16 %v1212_v27, %v1211_v33  ;;  %v1196_v41 = vld [vmem:[%s2649_s5 + $0x28] sm:$0xff]  ;;  %v1221_v8 = vld [vmem:[%s2649_s5 + $0xf0] sm:$0xff]  ;;  %v1222_v20 = vld [vmem:[%s2649_s5 + $0xf8] sm:$0xff] }
  0xe4   :  { %1806 = vrcp.f32 %v421_v6  ;;  %v1797_v19 = vpop.eup %1796  ;;  %v1214_v6 = vld [vmem:[%s2649_s5 + $0xb8] sm:$0xff]  ;;  %v1204_v43 = vld [vmem:[%s2649_s5 + $0x68] sm:$0xff]  ;;  %v1205_v63 = vld [vmem:[%s2649_s5 + $0x70] sm:$0xff] }
  0xe5   :  { %1808 = vrcp.f32 %v415_v22  ;;  %v1799_v32 = vpop.eup %1798  ;;  %v420_v11 = vadd.f32 1.0, %v1797_v19  ;;  %v1588_v22 = vpack.c.bf16 %v1214_v6, %v1213_v3  ;;  %v1602_v1 = vpack.c.bf16 %v1204_v43, %v1203_v54  ;;  %v1206_v38 = vld [vmem:[%s2649_s5 + $0x78] sm:$0xff] }
  0xe6   :  { %1810 = vpow2.f32 %v1426_v42  ;;  %v414_v39 = vadd.f32 1.0, %v1799_v32  ;;  %1143 = vmatpush1.bf16.msra.mxu0 %v1734_v46  ;;  %v1586_v42 = vpack.c.bf16 %v1196_v41, %v1195_v35  ;;  %v1197_v46 = vld [vmem:[%s2649_s5 + $0x30] sm:$0xff] }
  0xe7   :  { %1812 = vrcp.f32 %v420_v11  ;;  %1144 = vmatprep.subr.bf16.mxu0 %v1742_v23  ;;  %v1198_v23 = vld [vmem:[%s2649_s5 + $0x38] sm:$0xff] }
  0xe8   :  { %1814 = vrcp.f32 %v414_v39  ;;  %v1590_v19 = vpack.c.bf16 %v1198_v23, %v1197_v46 }
  0xe9   :  { %v1801_v44 = vpop.eup %1800 }
  0xea   :  { %v1803_v47 = vpop.eup %1802  ;;  %v418_v13 = vadd.f32 1.0, %v1801_v44  ;;  %1145 = vmatpush1.bf16.msra.mxu0 %v1740_v40 }
  0xeb   :  { %1146 = vmatprep.subr.bf16.mxu0 %v1748_v5  ;;  %v419_v51 = vadd.f32 1.0, %v1803_v47  ;;  %v554_v5 = vlaneseq }
  0xec   :  { %1816 = vrcp.f32 %v418_v13  ;;  %v552_v13 = vld [vmem:[%s2648_s4] sm:$0x3] }
  0xed   :  { %v1805_v14 = vpop.eup %1804  ;;  %v555_v44 = vshrl.u32 %v554_v5, 7 }
  0xee   :  { %v1807_v50 = vpop.eup %1806  ;;  %v424_v29 = vadd.f32 1.0, %v1805_v14  ;;  %1147 = vmatpush1.bf16.msra.mxu0 %v1746_v48 }
  0xef   :  { %v1809_v52 = vpop.eup %1808  ;;  %1148 = vmatprep.subr.bf16.mxu0 %v1754_v49  ;;  %v556_v47 = vsub.s32 0, %v555_v44  ;;  %v560_v48 = vsub.s32 1, %v555_v44 }
  0xf0   :  { %v1811_v57 = vpop.eup %1810  ;;  %1818 = vrcp.f32 %v424_v29  ;;  %v451_v26 = vpack.c.bf16 %v1807_v50, %v1809_v52 }
  0xf1   :  { %v425_v4 = vadd.f32 1.0, %v1811_v57  ;;  %v1813_v61 = vpop.eup %1812  ;;  %1820 = vrcp.f32 %v419_v51  ;;  %v557_v49 = vrot.slane %v552_v13, %v556_v47  ;;  %v561_v14 = vrot.slane %v552_v13, %v560_v48 }
  0xf2   :  { %1076 = vmatprep.mubr.bf16.mxu1 %v451_v26  ;;  %v1815_v56 = vpop.eup %1814  ;;  %1149 = vmatpush1.bf16.msra.mxu0 %v1752_v53 }
  0xf3   :  { %1822 = vrcp.f32 %v425_v4  ;;  %1150 = vmatprep.subr.bf16.mxu0 %v1760_v45  ;;  %v450_v59 = vpack.c.bf16 %v1813_v61, %v1815_v56 }
  0xf5   :  { %1077 = vmatmul.mubr.bf16.vlgmr.msra.gmra.mrb[0].mxu1 %v450_v59 }
  0xf6   :  { %1151 = vmatpush1.bf16.msra.mxu0 %v1758_v58  ;;  %v1817_v17 = vpop.eup %1816  ;;  %1579 = vmatpush3.bf16.msra.mxu1 %v1578_v21  ;;  %v1604_v21 = vpack.c.bf16 %v1222_v20, %v1221_v8 }
  0xf7   :  { %1152 = vmatprep.subr.bf16.mxu0 %v1763_v60  ;;  %1581 = vmatprep.subr.bf16.mxu1 %v1580_v36  ;;  %v1606_v36 = vpack.c.bf16 %v1206_v38, %v1205_v63 }
  0xfa   :  { %v1819_v12 = vpop.eup %1818  ;;  %1153 = vmatpush1.bf16.msra.mxu0 %v1761_v28  ;;  %1583 = vmatpush3.bf16.msra.mxu1 %v1582_v24  ;;  %v1215_v28 = vld [vmem:[%s2649_s5 + $0xc0] sm:$0xff] }
  0xfb   :  { %v454_v0 = vpack.c.bf16 %v1819_v12, %v1817_v17  ;;  %v1821_v7 = vpop.eup %1820  ;;  %1154 = vmatprep.subr.bf16.mxu0 %v1766_v16  ;;  %1585 = vmatprep.subr.bf16.mxu1 %v1584_v34  ;;  %v1216_v16 = vld [vmem:[%s2649_s5 + $0xc8] sm:$0xff]  ;;  %v1199_v12 = vld [vmem:[%s2649_s5 + $0x40] sm:$0xff] }
  0xfc   :  { %v1592_v17 = vpack.c.bf16 %v1216_v16, %v1215_v28 }
  0xfd   :  { %v1823_v10 = vpop.eup %1822 }
  0xfe   :  { %v455_v31 = vpack.c.bf16 %v1823_v10, %v1821_v7  ;;  %1155 = vmatpush1.bf16.msra.mxu0 %v1764_v62  ;;  %1587 = vmatpush3.bf16.msra.mxu1 %v1586_v42  ;;  %v1200_v62 = vld [vmem:[%s2649_s5 + $0x48] sm:$0xff]  ;;  %v1217_v7 = vld [vmem:[%s2649_s5 + $0xd0] sm:$0xff] }
  0xff   :  { %1156 = vmatprep.subr.bf16.mxu0 %v1769_v9  ;;  %1589 = vmatprep.subr.bf16.mxu1 %v1588_v22  ;;  %v1218_v9 = vld [vmem:[%s2649_s5 + $0xd8] sm:$0xff] }
 0x100   :  { %1162 = vmatprep.mubr.bf16.mxu0 %v455_v31  ;;  %v1596_v10 = vpack.c.bf16 %v1218_v9, %v1217_v7  ;;  %v1201_v31 = vld [vmem:[%s2649_s5 + $0x50] sm:$0xff] }
 0x102   :  { %1157 = vmatpush1.bf16.msra.mxu0 %v1767_v55  ;;  %1591 = vmatpush3.bf16.msra.mxu1 %v1590_v19  ;;  %v1202_v55 = vld [vmem:[%s2649_s5 + $0x58] sm:$0xff]  ;;  %v1310_v19 = vld [vmem:[%s2650_s6] sm:$0xff] }
 0x103   :  { %1158 = vmatprep.subr.bf16.mxu0 %v1772_v18  ;;  %1593 = vmatprep.subr.bf16.mxu1 %v1592_v17  ;;  %v1598_v18 = vpack.c.bf16 %v1202_v55, %v1201_v31 }
 0x106   :  { %1159 = vmatpush1.bf16.msra.mxu0 %v1770_v2  ;;  %v1219_v2 = vld [vmem:[%s2649_s5 + $0xe0] sm:$0xff] }
 0x107   :  { %1160 = vmatprep.subr.bf16.mxu0 %v1775_v30  ;;  %v1220_v30 = vld [vmem:[%s2649_s5 + $0xe8] sm:$0xff] }
 0x10a   :  { %1161 = vmatpush1.bf16.msra.mxu0 %v1773_v15  ;;  %v1600_v15 = vpack.c.bf16 %v1220_v30, %v1219_v2 }
 0x10d   :  { %1163 = vmatmul.mubr.bf16.vlgmr.msra.gmra.mrb[0].mxu0 %v454_v0  ;;  %v1594_v0 = vpack.c.bf16 %v1200_v62, %v1199_v12 }
 0x10f   :  { %1595 = vmatpush3.bf16.msra.mxu1 %v1594_v0 }
 0x110   :  { %1597 = vmatprep.subr.bf16.mxu1 %v1596_v10 }
 0x113   :  { %1599 = vmatpush3.bf16.msra.mxu1 %v1598_v18 }
 0x114   :  { %1601 = vmatprep.subr.bf16.mxu1 %v1600_v15 }
 0x117   :  { %1603 = vmatpush3.bf16.msra.mxu1 %v1602_v1 }
 0x118   :  { %1605 = vmatprep.subr.bf16.mxu1 %v1604_v21 }
 0x11b   :  { %1607 = vmatpush3.bf16.msra.mxu1 %v1606_v36 }
 0x1c8   :  { %v1078_v32 = vpop.f32.mrb[0].mxu1 }
 0x1c9   :  { %v1080_v11 = vpop.f32.mrb[1].mxu1  ;;  %v1079_v50 = vadd.f32 %v1078_v32, %v557_v49  ;;  %v1311_v32 = vld [vmem:[%s2650_s6 + $0x8] sm:$0x3] }
 0x1ca   :  { %v1082_v39 = vpop.f32.mrb[2].mxu1  ;;  %v1081_v51 = vadd.f32 %v1080_v11, %v561_v14  ;;  %v1608_v11 = vpack.c.bf16 %v1311_v32, %v1310_v19 }
 0x1cb   :  { %v1084_v40 = vpop.f32.mrb[3].mxu1  ;;  %v1083_v52 = vadd.f32 %v1082_v39, %v557_v49 }
 0x1cc   :  { %v1085_v26 = vadd.f32 %v1084_v40, %v561_v14  ;;  %1610 = vmatprep.subr.msk.bf16.mxu1 %vm1609_vm5, %v1608_v11 }
 0x1e0   :  { %v1164_v29 = vpop.f32.mrb[0].mxu0 }
 0x1e1   :  { %v1615_v53 = vadd.f32 %v1164_v29, %v1079_v50  ;;  %v1166_v57 = vpop.f32.mrb[1].mxu0 }
 0x1e2   :  { %v1617_v45 = vadd.f32 %v1166_v57, %v1081_v51  ;;  %v1168_v4 = vpop.f32.mrb[2].mxu0 }
 0x1e3   :  { %v1619_v61 = vadd.f32 %v1168_v4, %v1083_v52  ;;  %v1170_v56 = vpop.f32.mrb[3].mxu0  ;;  %v1523_v52 = vld [vmem:[%s2651_s7] ss:$0 sm:$0xff] }
 0x1e4   :  { %v1621_v58 = vadd.f32 %v1170_v56, %v1085_v26  ;;  %v1173_v59 = vmax.f32 %v1615_v53, %v1617_v45 }
 0x1e6   :  { %1174 = vmax.xlane.f32.xlu0 %v1173_v59  ;;  %v1176_v60 = vmax.f32 %v1619_v61, %v1621_v58 }
 0x1e8   :  { %1177 = vmax.xlane.f32.xlu1 %v1176_v60 }
 0x273   :  { %v1175_v25 = vpop.xlane.xlu0 %1174 }
 0x274   :  { %v1179_v37 = vsub.f32 %v1615_v53, %v1175_v25  ;;  %v1180_v33 = vsub.f32 %v1617_v45, %v1175_v25 }
 0x275   :  { %v1178_v27 = vpop.xlane.xlu1 %1177 }
 0x276   :  { %v1183_v24 = vmul.f32 1.442695, %v1179_v37  ;;  %v1185_v34 = vmul.f32 1.442695, %v1180_v33  ;;  %v1181_v35 = vsub.f32 %v1619_v61, %v1178_v27  ;;  %v1182_v41 = vsub.f32 %v1621_v58, %v1178_v27 }
 0x278   :  { %1824 = vpow2.f32 %v1183_v24  ;;  %v1189_v3 = vmul.f32 1.442695, %v1182_v41  ;;  %v1187_v6 = vmul.f32 1.442695, %v1181_v35 }
 0x279   :  { %1826 = vpow2.f32 %v1185_v34 }
 0x27a   :  { %1828 = vpow2.f32 %v1189_v3 }
 0x27b   :  { %1830 = vpow2.f32 %v1187_v6 }
 0x282   :  { %v1825_v42 = vpop.eup %1824 }
 0x283   :  { %v1827_v22 = vpop.eup %1826 }
 0x284   :  { %1287 = vmatprep.mubr.f32.mxu1 %v1827_v22  ;;  %v1829_v46 = vpop.eup %1828 }
 0x285   :  { %1288 = vmatmul.mubr.f32.vlgmr.msra.gmra.mrb[4].mxu1 %v1825_v42  ;;  %v1831_v23 = vpop.eup %1830 }
 0x286   :  { %1292 = vmatprep.mubr.f32.mxu1 %v1829_v46  ;;  %1613 = vmatpush3.bf16.msk.msra.mxu1 %vm1609_vm5, %v1608_v11 }
 0x289   :  { %1293 = vmatmul.mubr.f32.gmra.mrb[6].mxu1 %v1831_v23 }
 0x358   :  { %v1559_v39 = vpop.f32.mrb[4].mxu1 }
 0x359   :  { %v1560_v40 = vpop.f32.mrb[5].mxu1 }
 0x35a   :  { %v1561_v5 = vadd.f32 %v1560_v40, %v1559_v39 }
 0x35c   :  { %1832 = vrcp.f32 %v1561_v5  ;;  %v1562_v44 = vpop.f32.mrb[6].mxu1 }
 0x35d   :  { %v1563_v47 = vpop.f32.mrb[7].mxu1 }
 0x35e   :  { %v1564_v13 = vadd.f32 %v1563_v47, %v1562_v44 }
 0x360   :  { %1834 = vrcp.f32 %v1564_v13 }
 0x366   :  { %v1833_v48 = vpop.eup %1832 }
 0x367   :  { %1302 = vrot.lane.b32.xlu0 %v1833_v48, %s1855_s30 }
 0x36a   :  { %v1835_v49 = vpop.eup %1834 }
 0x36b   :  { %1304 = vrot.lane.b32.xlu1 %v1835_v49, %s1855_s30 }
 0x3d9   :  { %v1303_v14 = vpop.permute.xlu0 %1302 }
 0x3da   :  { %v1308_v50 = vmul.f32 %v1561_v5, %v1303_v14 }
 0x3dc   :  { %1573 = vmatprep.mubr.msk.f32.mxu1 %vm1319_vm6, %v1308_v50 }
 0x3dd   :  { %v1305_v51 = vpop.permute.xlu1 %1304 }
 0x3de   :  { %v1309_v29 = vmul.f32 %v1564_v13, %v1305_v51 }
 0x3e0   :  { %1574 = vmatmul.mubr.msk.f32.vlgmr.msra.gmra.mrb[8].mxu1 %vm1319_vm6, %v1309_v29 }
 0x4b3   :  { %v1575_v53 = vpop.f32.mrb[8].mxu1 }
 0x4b4   :  { %v1402_v57 = vadd.f32 %v1575_v53, %v1523_v52  ;;  %v1396_v26 = vpop.f32.mrb[9].mxu1 }
 0x4b5   :  { %v1397_v45 = vadd.f32 %v1523_v52, %v1396_v26 }
 0x4b6   :  { %1406 = vst [vmem:[%s2652_s8 + $0x8] sm:$0xff] %v1402_v57 }
 0x4b7   :  { %1405 = vst [vmem:[%s2652_s8] sm:$0xff] %v1397_v45 }
 0x4b8   :  { %1411 = vsyncpa [#allocation4], 1 }

</bundles_post_ra>
